<compile_context>
chip_gen: v7x
topology: tpu7x:2x2x1
jax: 0.10.0
libtpu: 0.0.40
codegen_flags: <defaults>
</compile_context>

<pallas_src>
import functools
import math

import jax
import jax.numpy as jnp
from jax.experimental import pallas as pl
from jax.experimental.pallas import tpu as pltpu


def _rup(x, m):
    return (int(x) + m - 1) // m * m


def _tile_vmem_bytes(shape, itemsize):
    """Lane/sublane-padded VMEM bytes for one buffer of `shape`."""
    shape = tuple(int(d) for d in shape)
    if len(shape) == 0:
        return itemsize
    if len(shape) == 1:
        return _rup(shape[0] * itemsize, 512)
    *lead, s2, s1 = shape
    lead_n = 1
    for d in lead:
        lead_n *= d
    sub = max(1, 32 // itemsize)        # 8 for f32, 16 for bf16, 32 for int8
    return lead_n * _rup(s2, sub) * _rup(s1, 128) * itemsize


# --------------------------------------------------------------------------- #
# Kernels: ONE MXU dot over K = 9*Cin, fused LeakyReLU, lane-dense store.
# --------------------------------------------------------------------------- #
def _packed_kernel(x_ref, w_ref, o_ref, *, negative_slope):
    """x_ref: (1, th, Wo, 9*Cin) im2col tile; w_ref: (9*Cin, tn); o_ref: (1, th, Wo, tn)."""
    _, th, wo, k9 = x_ref.shape
    tn = o_ref.shape[-1]
    lhs = x_ref[0].reshape(th * wo, k9)
    acc = jnp.dot(lhs, w_ref[...], preferred_element_type=jnp.float32)
    acc = jnp.where(acc >= 0.0, acc, negative_slope * acc)          # fused LeakyReLU
    o_ref[...] = acc.reshape(1, th, wo, tn).astype(o_ref.dtype)


def _phase_kernel(x_ref, w_ref, o_ref, *, stride, negative_slope):
    """x_ref: (1, s*s, Hps, Wps, Cin) resident phase-split image of one batch element.
    w_ref: (9*Cin, tn); o_ref: (1, th, Wo, tn)."""
    s = stride
    cin = x_ref.shape[-1]
    _, th, wo, tn = o_ref.shape
    t = pl.program_id(1)
    row0 = pl.multiple_of(t * th, 8)                                 # th is a multiple of 8
    patches = []
    for kh in range(3):
        p, a = kh % s, kh // s                                       # H phase / block offset
        for kw in range(3):
            q, b = kw % s, kw // s                                   # W phase / block offset
            patches.append(
                x_ref[0, p * s + q, pl.ds(row0 + a, th), pl.ds(b, wo), :])
    # Tap K-fold: one (th*Wo, 9*Cin) LHS -> a single MXU contraction.
    lhs = jnp.concatenate(patches, axis=-1).reshape(th * wo, 9 * cin)
    acc = jnp.dot(lhs, w_ref[...], preferred_element_type=jnp.float32)
    acc = jnp.where(acc >= 0.0, acc, negative_slope * acc)
    o_ref[...] = acc.reshape(1, th, wo, tn).astype(o_ref.dtype)


# --------------------------------------------------------------------------- #
# Wrapper
# --------------------------------------------------------------------------- #
def conv_block(x_nchw, weight_oihw, stride, negative_slope=0.2,
               compute_dtype=jnp.bfloat16, out_layout="NCHW", strategy=None):
    """Forward of ConvBlock. x: (N, Cin, H, W); weight: (Cout, Cin, 3, 3); no bias.

    compute_dtype: MXU operand dtype (accumulation is always f32). None -> x.dtype.
    out_layout   : "NCHW" (matches the PyTorch module) or "NHWC" (skips final transpose).
    strategy     : None (auto), "packed" (glue im2col) or "phase" (resident phase image).
    """
    N, Cin, H, W = map(int, x_nchw.shape)
    Cout = int(weight_oihw.shape[0])
    s = int(stride)
    out_dtype = x_nchw.dtype
    cdt = out_dtype if compute_dtype is None else compute_dtype
    itemsize = jnp.dtype(cdt).itemsize
    out_itemsize = jnp.dtype(out_dtype).itemsize

    Ho = (H + 2 - 3) // s + 1
    Wo = (W + 2 - 3) // s + 1
    K9 = 9 * Cin
    cout_pad = _rup(Cout, 128)                         # lane-dense output channels

    # ---- Cout tile (tn): 256-wide MXU tile on v6e/v7x; one tile when it fits -----
    if cout_pad <= 256:
        tn = cout_pad
    elif cout_pad % 256 == 0:
        tn = 256
    else:
        tn = 128
    Tc = cout_pad // tn

    # ---- output-row tile: multiple of 8, ~1024 output pixels, f32 acc <= 512 KiB --
    th = pl.cdiv(1024, Wo)
    th = min(th, Ho)
    th = _rup(th, 8)
    while th > 8 and th * Wo * tn * 4 > 512 * 1024:
        th -= 8

    # ---- per-generation VMEM ceiling ----------------------------------------------
    try:
        vmem_cap = int(pltpu.get_tpu_info().vmem_capacity_bytes)
    except Exception:
        vmem_cap = 64 * 1024 * 1024                    # conservative (v7x per-TC)
    vmem_ceiling = min(vmem_cap - (8 << 20), int(vmem_cap * 0.85))

    a_max = 2 // s

    def _dot_scratch(th_):
        return (_tile_vmem_bytes((th_ * Wo, K9), itemsize)
                + _tile_vmem_bytes((th_ * Wo, tn), 4))

    def _packed_bytes(th_):
        return (2 * _tile_vmem_bytes((1, th_, Wo, K9), itemsize)         # lhs, dbl-buffered
                + 2 * _tile_vmem_bytes((K9, tn), itemsize)               # weights
                + 2 * _tile_vmem_bytes((1, th_, Wo, tn), out_itemsize)   # out tile
                + _dot_scratch(th_))

    def _phase_bytes(th_, tt_):
        hps = tt_ * th_ + a_max
        wps = Wo + a_max
        return (2 * _tile_vmem_bytes((1, s * s, hps, wps, Cin), itemsize)  # resident image
                + 2 * _tile_vmem_bytes((K9, tn), itemsize)
                + 2 * _tile_vmem_bytes((1, th_, Wo, tn), out_itemsize)
                + _dot_scratch(th_))

    # shrink th until the (always available) packed working set fits the ceiling
    while th > 8 and _packed_bytes(th) > vmem_ceiling:
        th -= 8
    Tt = pl.cdiv(Ho, th)
    Ho_pad = Tt * th

    # ---- strategy: resident phase image (1x HBM) only when channels are lane-dense
    # and the double-buffered, lane-padded image fits the VMEM budget --------------
    if strategy is None:
        strategy = ("phase" if (Cin % 128 == 0 and
                                _phase_bytes(th, Tt) <= vmem_ceiling)
                    else "packed")
    # TODO(synk): halo-tiled H blocking (Element-indexed / manual DMA double buffer)
    # for images whose resident phase-split block exceeds VMEM, instead of falling
    # back to the im2col path.

    # ---- glue: build the LHS and weights ------------------------------------------
    if strategy == "phase":
        Hps = Ho_pad + a_max
        Wps = Wo + a_max
        Hpe, Wpe = Hps * s, Wps * s
        xp = jnp.pad(x_nchw, ((0, 0), (0, 0),
                              (1, max(0, Hpe - 1 - H)), (1, max(0, Wpe - 1 - W))))
        xp = xp[:, :, :Hpe, :Wpe]
        if s == 1:
            # stride-1 phase decomposition is the identity: pad + NHWC only.
            xph = jnp.transpose(xp, (0, 2, 3, 1))[:, None]          # (N,1,Hps,Wps,Cin)
        else:
            # xph[n, p*s+q, i, j, c] == x_padded[n, c, i*s + p, j*s + q]
            xph = (xp.reshape(N, Cin, Hps, s, Wps, s)
                     .transpose(0, 3, 5, 2, 4, 1)
                     .reshape(N, s * s, Hps, Wps, Cin))
        lhs_arr = xph.astype(cdt)
        # block index constant along (t, c): the image is DMA'd once per batch element
        lhs_spec = pl.BlockSpec((1, s * s, Hps, Wps, Cin),
                                lambda n, t, c: (n, 0, 0, 0, 0))
        kernel = functools.partial(_phase_kernel, stride=s,
                                   negative_slope=float(negative_slope))
    else:
        # glue-side im2col: (N, Ho_pad, Wo, 9*Cin), tap-major / channel-minor.
        Hneed = (Ho_pad - 1) * s + 3
        Wneed = (Wo - 1) * s + 3
        xp = jnp.pad(x_nchw, ((0, 0), (0, 0),
                              (1, max(0, Hneed - 1 - H)), (1, max(0, Wneed - 1 - W))))
        xp = jnp.transpose(xp, (0, 2, 3, 1))                         # NHWC (fused by XLA)
        taps = []
        for kh in range(3):
            for kw in range(3):
                taps.append(xp[:, kh:kh + (Ho_pad - 1) * s + 1:s,
                               kw:kw + (Wo - 1) * s + 1:s, :])
        lhs_arr = jnp.concatenate(taps, axis=-1).astype(cdt)         # (N, Ho_pad, Wo, 9*Cin)
        lhs_spec = pl.BlockSpec((1, th, Wo, K9), lambda n, t, c: (n, t, 0, 0))
        kernel = functools.partial(_packed_kernel,
                                   negative_slope=float(negative_slope))

    # weights OIHW -> (9*Cin, Cout_pad), tap-major / channel-minor (matches LHS).
    w = jnp.transpose(weight_oihw, (2, 3, 1, 0)).reshape(K9, Cout)
    if cout_pad != Cout:
        w = jnp.pad(w, ((0, 0), (0, cout_pad - Cout)))
    w = w.astype(cdt)

    needed = _phase_bytes(th, Tt) if strategy == "phase" else _packed_bytes(th)
    vmem_limit = int(min(vmem_ceiling, max(needed + needed // 2, 32 << 20)))

    cost = pl.CostEstimate(
        flops=int(2 * N * Ho_pad * Wo * K9 * cout_pad),
        transcendentals=0,
        bytes_accessed=int(lhs_arr.size * itemsize + w.size * itemsize
                           + N * Ho_pad * Wo * cout_pad * out_itemsize))

    out = pl.pallas_call(
        kernel,
        out_shape=jax.ShapeDtypeStruct((N, Ho_pad, Wo, cout_pad), out_dtype),
        grid_spec=pltpu.PrefetchScalarGridSpec(
            num_scalar_prefetch=0,
            grid=(N, Tt, Tc),
            in_specs=[lhs_spec,
                      pl.BlockSpec((K9, tn), lambda n, t, c: (0, c))],
            out_specs=pl.BlockSpec((1, th, Wo, tn), lambda n, t, c: (n, t, 0, c)),
        ),
        compiler_params=pltpu.CompilerParams(
            # No reduction axis (the K-fold put the whole contraction in one dot),
            # so every grid axis is independent; the v7x megacore can split any of
            # them (splitting the batch axis keeps input DMA at 1x for "phase").
            dimension_semantics=("parallel", "parallel", "parallel"),
            vmem_limit_bytes=vmem_limit,
        ),
        cost_estimate=cost,
    )(lhs_arr, w)

    out = out[:, :Ho, :, :Cout]          # drop row / channel padding
    if out_layout == "NHWC":
        return out
    return jnp.transpose(out, (0, 3, 1, 2))


def _reference(x, w, stride, slope=0.2):
    y = jax.lax.conv_general_dilated(
        x, w, window_strides=(stride, stride), padding=((1, 1), (1, 1)),
        dimension_numbers=("NCHW", "OIHW", "NCHW"))
    return jnp.where(y >= 0.0, y, slope * y)


if __name__ == "__main__":
    def make_inputs(key, n, cin, cout, hw):
        kx, kw = jax.random.split(key)
        x = jax.random.normal(kx, (n, cin, hw, hw), dtype=jnp.float32)
        bound = 1.0 / math.sqrt(cin * 9)
        wgt = jax.random.uniform(kw, (cout, cin, 3, 3), dtype=jnp.float32,
                                 minval=-bound, maxval=bound)
        return x, wgt

    # --- packed (small-Cin) path: strict f32 checks at stride 2 and 1 --------------
    x, w = make_inputs(jax.random.PRNGKey(0), 2, 4, 8, 16)
    for s in (2, 1):
        out = jax.block_until_ready(conv_block(x, w, s, compute_dtype=jnp.float32))
        ref = _reference(x, w, s)
        assert out.shape == ref.shape == (2, 8, 16 // s, 16 // s)
        assert jnp.allclose(out, ref, atol=1e-5, rtol=1e-5), f"packed f32 stride={s}"

    # --- packed path, default bf16 operands (f32 accumulation), loose tolerance ----
    out = jax.block_until_ready(conv_block(x, w, 2))
    ref = _reference(x.astype(jnp.bfloat16).astype(jnp.float32),
                     w.astype(jnp.bfloat16).astype(jnp.float32), 2)
    assert jnp.allclose(out, ref, atol=2e-2, rtol=2e-2), "packed bf16 stride=2"

    # --- phase (lane-dense Cin, resident image) path, bf16 operands ----------------
    x2, w2 = make_inputs(jax.random.PRNGKey(1), 2, 128, 32, 16)
    for s in (2, 1):
        out = jax.block_until_ready(conv_block(x2, w2, s, strategy="phase"))
        ref = _reference(x2.astype(jnp.bfloat16).astype(jnp.float32),
                         w2.astype(jnp.bfloat16).astype(jnp.float32), s)
        assert out.shape == ref.shape == (2, 32, 16 // s, 16 // s)
        assert jnp.allclose(out, ref, atol=2e-2, rtol=2e-2), f"phase bf16 stride={s}"

    # --- NHWC output path (skips the final transpose) ------------------------------
    out_nhwc = jax.block_until_ready(conv_block(x, w, 2, out_layout="NHWC"))
    assert out_nhwc.shape == (2, 8, 8, 8)

    print("KERNEL_OK")
</pallas_src>

<mosaic_0001>
module attributes {stable_mosaic.version = 11 : i64} {
  func.func @_packed_kernel(%arg0: i32, %arg1: i32, %arg2: i32, %arg3: memref<1x8x8x36xf32, #tpu.memory_space<vmem>>, %arg4: memref<36x128xf32, #tpu.memory_space<vmem>>, %arg5: memref<1x8x8x128xf32, #tpu.memory_space<vmem>>) attributes {dimension_semantics = [#tpu.dimension_semantics<parallel>, #tpu.dimension_semantics<parallel>, #tpu.dimension_semantics<parallel>], iteration_bounds = array<i64: 2, 1, 1>, scalar_prefetch = 0 : i64, scratch_operands = 0 : i64, tpu.core_type = #tpu.core_type<tc>, window_params = [{transform_indices = @transform_0, window_bounds = array<i64: 1, 8, 8, 36>}, {transform_indices = @transform_1, window_bounds = array<i64: 36, 128>}, {transform_indices = @transform_2, window_bounds = array<i64: 1, 8, 8, 128>}]} {
    %c0 = arith.constant 0 : index
    %c0_0 = arith.constant 0 : index
    %c0_1 = arith.constant 0 : index
    %c0_2 = arith.constant 0 : index
    %0 = vector.load %arg3[%c0, %c0_0, %c0_1, %c0_2] : memref<1x8x8x36xf32, #tpu.memory_space<vmem>>, vector<1x8x8x36xf32>
    %1 = vector.shape_cast %0 : vector<1x8x8x36xf32> to vector<8x8x36xf32>
    %2 = vector.shape_cast %1 : vector<8x8x36xf32> to vector<64x36xf32>
    %c0_3 = arith.constant 0 : index
    %c0_4 = arith.constant 0 : index
    %3 = vector.load %arg4[%c0_3, %c0_4] : memref<36x128xf32, #tpu.memory_space<vmem>>, vector<36x128xf32>
    %cst = arith.constant dense<0.000000e+00> : vector<64x128xf32>
    %4 = tpu.matmul %2, %3, %cst {dimension_numbers = #tpu.dot_dimension_numbers<[1], [0], [0], [1], [0, 0, 1, 1], [], []>} : vector<64x36xf32>, vector<36x128xf32>, vector<64x128xf32> -> vector<64x128xf32>
    %cst_5 = arith.constant 0.000000e+00 : f32
    %5 = vector.broadcast %cst_5 : f32 to vector<64x128xf32>
    %6 = arith.cmpf oge, %4, %5 : vector<64x128xf32>
    %cst_6 = arith.constant 2.000000e-01 : f32
    %7 = vector.broadcast %cst_6 : f32 to vector<64x128xf32>
    %8 = arith.mulf %7, %4 : vector<64x128xf32>
    %9 = arith.select %6, %4, %8 : vector<64x128xi1>, vector<64x128xf32>
    %10 = vector.shape_cast %9 : vector<64x128xf32> to vector<1x8x8x128xf32>
    %c0_7 = arith.constant 0 : index
    %c0_8 = arith.constant 0 : index
    %c0_9 = arith.constant 0 : index
    %c0_10 = arith.constant 0 : index
    %11 = vector.load %arg5[%c0_7, %c0_8, %c0_9, %c0_10] : memref<1x8x8x128xf32, #tpu.memory_space<vmem>>, vector<1x8x8x128xf32>
    tpu.vector_store %arg5[%c0_7, %c0_8, %c0_9, %c0_10], %10 {strides = array<i32>} : memref<1x8x8x128xf32, #tpu.memory_space<vmem>>, vector<1x8x8x128xf32>,
    return
  }
  func.func @transform_0(%arg0: i32, %arg1: i32, %arg2: i32) -> (i32, i32, i32, i32) {
    %c0_i32 = arith.constant 0 : i32
    %c0_i32_0 = arith.constant 0 : i32
    %c0_i32_1 = arith.constant 0 : i32
    return %arg0, %arg1, %c0_i32, %c0_i32_0 : i32, i32, i32, i32
  }
  func.func @transform_1(%arg0: i32, %arg1: i32, %arg2: i32) -> (i32, i32) {
    %c0_i32 = arith.constant 0 : i32
    %c0_i32_0 = arith.constant 0 : i32
    return %c0_i32, %arg2 : i32, i32
  }
  func.func @transform_2(%arg0: i32, %arg1: i32, %arg2: i32) -> (i32, i32, i32, i32) {
    %c0_i32 = arith.constant 0 : i32
    %c0_i32_0 = arith.constant 0 : i32
    return %arg0, %arg1, %c0_i32, %arg2 : i32, i32, i32, i32
  }
}

</mosaic_0001>

<bundles_post_ra>
// kernel: tpu_custom_call.1
= control target key start
LH: loop header
LB: loop body
LE: loop exit
PB: predicated region body
PF: predicated region fallthrough
CT: control target
= control target key end

     0   :  { %7 = vsyncpa [#allocation3], 0  ;;  %s1092_s0 = inlined_call_operand.hbm [shape: f32[2,8,8,36], index: 0, kind: input, shape index: {}]   ;;  %s1093_s1 = inlined_call_operand.hbm [shape: f32[36,128], index: 1, kind: input, shape index: {}]   ;;  %s1094_s2 = inlined_call_operand.hbm [shape: f32[2,8,8,128], index: 2, kind: output, shape index: {}]  }
   0x1   :  { %9 = vsyncpa [#allocation3 + $0x1], 0 }
   0x2   :  { %10 = vsyncpa [#allocation6], 0 }
   0x3   :  { %11 = vsyncpa [#allocation4], 0 }
   0x4   :  { %13 = vsyncpa [#allocation4 + $0x1], 0  ;;  %s834_s9 = smov 0   ;;  %s836_s10 = smov 0  }
   0x5   :  { %s838_s11 = smov 0   ;;  %s840_s12 = smov 0  }
   0x6   :  { %s842_s13 = smov 0   ;;  %s844_s14 = smov 0  }
   0x7 LB: > { %s512_s15 = sadd.s32 4294967295, %s810_s14   ;;  %s513_s16 = sadd.s32 4294967294, %s810_s14   ;;  %s810_s14 = sphi %s844_s14, %s19_s14   ;;  %s806_s13 = sphi %s842_s13, %s1118_s13   ;;  %s802_s12 = sphi %s840_s12, %s1117_s12   ;;  %s798_s11 = sphi %s838_s11, %s1116_s11   ;;  %s794_s10 = sphi %s836_s10, %s1115_s10   ;;  %s790_s9 = sphi %s834_s9, %s1114_s9  }
   0x8   : > { %p60_p0 = scmp.ne.s32.totalorder %s794_s10, %s790_s9  ;;  %p868_p1 = scmp.eq.s32.totalorder %s512_s15, 0 }
   0x9   : > { %p872_p2 = scmp.eq.s32.totalorder %s512_s15, 1  ;;  %p120_p3 = scmp.eq.s32.totalorder %s513_s16, 1 }
   0xa   : > { %s1099_s17 = scalar_select %p868_p1, 1, 0 }
   0xb   : > { %s1100_s18 = scalar_select %p872_p2, 1, 0 }
   0xc   : > { %p878_p4 = por %p868_p1, %p60_p0  ;;  %p514_p5 = scmp.ge.s32.totalorder %s810_s14, 1 }
   0xd   : > { %p883_p6 = por %p120_p3, %p60_p0  ;;  %p127_p7 = scmp.lt.s32.totalorder %s810_s14, 3 }
   0xe   : > { %s1101_s19 = scalar_select %p878_p4, 1, 0 }
   0xf   : > { %s1102_s20 = scalar_select %p883_p6, 1, 0 }
  0x10   : > { %p888_p8 = pnand %p514_p5, %p127_p7  ;;  %s812_s22 = smov [#allocation5]  }
  0x11   : > { %s141_s23 = sshll.u32 %s812_s22, 4  ;;  %s38_s25 = sadd.s32 1, %s806_s13  ;;  %s142_s23 = int_to_ptr.vmem [resolvable:$true] %s141_s23 }
  0x12   : > { %s1103_s21 = scalar_select %p888_p8, 1, 0 }
  0x13   : > { %p597_p9 = pneg %p888_p8  ;;  %s666_s28 = scalar_lea.hbm %s1093_s1, 640 }
  0x14   : > { %p667_p12 = scmp.ne.s32.totalorder %s1093_s1, %s666_s28  ;;  %p673_p5 = scmp.lt.u32.totalorder %s666_s28, %s1093_s1 }
  0x15   : > { %p897_p11 = pnand %p597_p9, %p868_p1 }
  0x17   : > { %p668_p13 = pneg %p897_p11 }
  0x19   : > { %p669_p0 = pnand %p668_p13, %p667_p12 }
  0x1b   : > { %p670_p3 = pneg %p669_p0 }
  0x1d   : > { %p675_p7 = pnand %p673_p5, %p670_p3 }
  0x1f   : > { %678 = shalt.err (!%p675_p7)
}
  0x20   : > { %s679_s5 = scalar_lea.vmem %s142_s23, 640  ;;  %p687_p1 = scmp.lt.s32.totalorder %s142_s23, %s142_s23 }
  0x21   : > { %p680_p9 = scmp.ne.s32.totalorder %s142_s23, %s679_s5  ;;  %p688_p4 = scmp.lt.s32.totalorder %s679_s5, %s679_s5 }
  0x23   : > { %p682_p10 = pnand %p680_p9, %p668_p13  ;;  %p689_p8 = por %p688_p4, %p687_p1 }
  0x25   : > { %p683_p6 = pneg %p682_p10 }
  0x27   : > { %p690_p2 = pnand %p689_p8, %p683_p6 }
  0x29   : > { %693 = shalt.err (!%p690_p2)
}
  0x2a   : > { %s813_s6 = smov 128   ;;  %s814_s7 = smov 8  }
  0x2b   : > { %600 = dma.hbm_to_vmem [thread:$0]  (!%p897_p11), %s1093_s1, 640, %s142_s23, [#allocation6], %s813_s6, %s813_s6, %s814_s7  }
  0x2c   : > { %p40_p1 = scmp.ge.s32.totalorder %s38_s25, 2  ;;  %s47_s16 = sadd.s32 1, %s798_s11 }
  0x2d   : > { %p54_p2 = scmp.ne.s32.totalorder %s798_s11, %s794_s10  ;;  %p55_p4 = scmp.eq.s32.totalorder %s810_s14, 0 }
  0x2e   : > { %s1120_s25 = smov (%p40_p1, %s38_s25), 0  ;;  %p1106_p8 = scmp.ne.s32.totalorder %s1100_s18, 0 }
  0x2f   : > { %p927_p6 = por %p55_p4, %p54_p2  ;;  %s42_s26 = ssub.s32 %s806_s13, %s1120_s25 }
  0x30   : > { %p933_p10 = por %p1106_p8, %p54_p2  ;;  %p610_p12 = scmp.lt.s32.totalorder %s810_s14, 2 }
  0x31   : > { %p45_p11 = scmp.eq.s32.totalorder %s42_s26, 0  ;;  %s155_s23 = sand.u32 1, %s798_s11  }
  0x32   : > { %s517_s27 = sshll.u32 %s155_s23, 6  ;;  %s538_s29 = sshll.u32 %s806_s13, 10 }
  0x33   : > { %s942_s28 = scalar_select %p45_p11, %s798_s11, %s47_s16  }
  0x34   : > { %s948_s4 = scalar_lea.hbm %s1092_s0, %s538_s29  ;;  %s159_s18 = scalar_lea.vmem [#allocation2], %s517_s27 }
  0x35   : > { %s168_s5 = sshll.u32 %s159_s18, 4  ;;  %p954_p13 = pnand %p610_p12, %p927_p6  ;;  %s950_s5 = int_to_ptr.vmem [resolvable:$true] %s168_s5 }
  0x36   : > { %s958_s15 = scalar_lea.sflag [#allocation3], %s155_s23  ;;  %s694_s16 = scalar_lea.hbm %s948_s4, 1024 }
  0x37   : > { %p695_p0 = scmp.ne.s32.totalorder %s948_s4, %s694_s16  ;;  %p696_p3 = pneg %p954_p13 }
  0x38   : > { %s699_s22 = scalar_lea.hbm %s1092_s0, 2048  ;;  %p700_p9 = scmp.lt.u32.totalorder %s948_s4, %s1092_s0 }
  0x39   : > { %p697_p5 = pnand %p696_p3, %p695_p0  ;;  %p701_p1 = scmp.lt.u32.totalorder %s699_s22, %s694_s16 }
  0x3a   : > { %p703_p4 = scmp.lt.u32.totalorder %s694_s16, %s948_s4 }
  0x3b   : > { %p698_p7 = pneg %p697_p5  ;;  %p702_p2 = por %p701_p1, %p700_p9 }
  0x3d   : > { %p704_p6 = por %p703_p4, %p702_p2 }
  0x3f   : > { %p705_p8 = pnand %p704_p6, %p698_p7 }
  0x41   : > { %708 = shalt.err (!%p705_p8)
}
  0x42   : > { %s709_s23 = scalar_lea.vmem %s950_s5, 1024  ;;  %s815_s3 = smov [#allocation2]  }
  0x43   : > { %p710_p12 = scmp.ne.s32.totalorder %s950_s5, %s709_s23  ;;  %s714_s18 = sshll.u32 %s815_s3, 4  ;;  %s715_s18 = int_to_ptr.vmem [resolvable:$false] %s714_s18 }
  0x44   : > { %s716_s26 = scalar_lea.vmem %s715_s18, 2048  ;;  %p717_p5 = scmp.lt.s32.totalorder %s950_s5, %s715_s18 }
  0x45   : > { %p712_p11 = pnand %p710_p12, %p696_p3  ;;  %p718_p9 = scmp.lt.s32.totalorder %s716_s26, %s709_s23 }
  0x47   : > { %p713_p0 = pneg %p712_p11  ;;  %p719_p1 = por %p718_p9, %p717_p5 }
  0x49   : > { %p720_p2 = pnand %p719_p1, %p713_p0 }
  0x4b   : > { %723 = shalt.err (!%p720_p2)
}
  0x4c   : > { %604 = dma.hbm_to_vmem [thread:$0]  (!%p954_p13), %s948_s4, 1024, %s950_s5, %s958_s15, %s813_s6, %s813_s6, %s814_s7  }
  0x4d   : > { %p1109_p3 = scmp.ne.s32.totalorder %s1103_s21, 0 }
  0x4e   : > { %s992_s16 = sand.u32 (!%p1109_p3), 1, %s794_s10   ;;  %p1110_p7 = scmp.ne.s32.totalorder (!%p1109_p3), %s1101_s19, 0 }
  0x4f   : > { %180 = sbr.rel (%p1109_p3) target bundleno = 339 (0x153), region = 28  ;;  %s521_s27 = sshll.u32 (!%p1109_p3), %s992_s16, 6 }
  0x50   : > { %s183_s22 = scalar_lea.sflag (!%p1109_p3), [#allocation3], %s992_s16  ;;  %s998_s8 = scalar_lea.vmem (!%p1109_p3), [#allocation2], %s521_s27 }
  0x56   : > { %777 = dma.done.wait (%p1110_p7), %s183_s22, 1024  }
  0x57   : > { %779 = vsyncadd (%p1110_p7), %s183_s22, 4294966272  ;;  %p1111_p13 = scmp.ne.s32.totalorder %s1099_s17, 0 }
  0x59   : > { %781 = dma.done.wait (%p1111_p13), [#allocation6], 640  }
  0x5a   : > { %783 = vsyncadd (%p1111_p13), [#allocation6], 4294966656  ;;  %vm226_vm0 = vcmask 293888   ;;  %v221_v0 = vld [vmem:[#allocation5] sm:$0xff]  ;;  %v222_v1 = vld [vmem:[#allocation5 + $0x8] sm:$0xff]  ;;  %vm251_vm1 = vcmask 1043456  }
  0x5b   : > { %v223_v2 = vld [vmem:[#allocation5 + $0x10] sm:$0xff]  ;;  %v575_v3 = vpack.c.bf16 %v222_v1, %v221_v0  ;;  %v224_v4 = vld [vmem:[#allocation5 + $0x18] sm:$0xff]  ;;  %v213_v5 = vld [vmem:[%s998_s8] sm:$0xff]  ;;  %s1026_s17 = scalar_lea.vmem [#allocation7], %s521_s27  ;;  %s539_s21 = sshll.u32 %s802_s12, 10 }
  0x5c   : > { %v579_v6 = vpack.c.bf16 %v224_v4, %v223_v2  ;;  %563 = vmatprep.mubr.msk.f32.mxu0 %vm226_vm0, %v213_v5  ;;  %v217_v7 = vld [vmem:[%s998_s8 + $0x20] sm:$0xff]  ;;  %v214_v9 = vld [vmem:[%s998_s8 + $0x8] sm:$0xff]  ;;  %v215_v11 = vld [vmem:[%s998_s8 + $0x10] sm:$0xff]  ;;  %s409_s19 = sshll.u32 %s1026_s17, 4  ;;  %s1039_s7 = scalar_lea.hbm %s1094_s2, %s539_s21  ;;  %s1032_s19 = int_to_ptr.vmem [resolvable:$true] %s409_s19 }
  0x5d   : > { %576 = vmatprep.subr.bf16.mxu0 %v575_v3  ;;  %583 = vmatprep.subr.bf16.mxu1 %v575_v3  ;;  %v225_v8 = vld [vmem:[#allocation5 + $0x20] sm:$0xf]  ;;  %v218_v10 = vld [vmem:[%s998_s8 + $0x28] sm:$0xff]  ;;  %v219_v12 = vld [vmem:[%s998_s8 + $0x30] sm:$0xff]  ;;  %s393_s4 = scalar_lea.sflag [#allocation4], %s992_s16  ;;  %s724_s5 = scalar_lea.vmem %s1032_s19, 1024 }
  0x5e   : > { %578 = vmatpush3.bf16.msra.mxu0 %v575_v3  ;;  %586 = vmatpush3.bf16.msra.mxu1 %v575_v3  ;;  %v216_v13 = vld [vmem:[%s998_s8 + $0x18] sm:$0xff]  ;;  %p725_p4 = scmp.ne.s32.totalorder %s1032_s19, %s724_s5  ;;  %s816_s15 = smov [#allocation7]  }
  0x5f   : > { %580 = vmatprep.subr.bf16.mxu0 %v579_v6  ;;  %584 = vmatprep.subr.bf16.mxu1 %v579_v6  ;;  %v220_v14 = vld [vmem:[%s998_s8 + $0x38] sm:$0xff]  ;;  %s728_s29 = sshll.u32 %s816_s15, 4  ;;  %s729_s29 = int_to_ptr.vmem [resolvable:$false] %s728_s29 }
  0x60   : > { %569 = vmatprep.mubr.msk.f32.mxu1 %vm226_vm0, %v217_v7  ;;  %p726_p6 = pnand %p725_p4, %p933_p10  ;;  %s730_s30 = scalar_lea.vmem %s729_s29, 2048 }
  0x61   : > { %p731_p12 = scmp.lt.s32.totalorder %s1032_s19, %s729_s29  ;;  %p732_p11 = scmp.lt.s32.totalorder %s730_s30, %s724_s5 }
  0x62   : > { %582 = vmatpush3.bf16.msra.mxu0 %v579_v6  ;;  %587 = vmatpush3.bf16.msra.mxu1 %v579_v6  ;;  %p727_p8 = pneg %p726_p6 }
  0x63   : > { %561 = vmatprep.subr.msk.mxu0 %vm251_vm1, %v225_v8  ;;  %585 = vmatprep.subr.msk.mxu1 %vm251_vm1, %v225_v8  ;;  %p733_p0 = por %p732_p11, %p731_p12 }
  0x65   : > { %p734_p5 = pnand %p733_p0, %p727_p8 }
  0x66   : > { %562 = vmatpush3.msk.msra.mxu0 %vm251_vm1, %v225_v8  ;;  %588 = vmatpush3.msk.msra.mxu1 %vm251_vm1, %v225_v8 }
  0x67   : > { %564 = vmatmul.mubr.msk.f32.vlgmr.msra.gmra.mrb[0].mxu0 %vm226_vm0, %v214_v9  ;;  %570 = vmatmul.mubr.msk.f32.vlgmr.msra.gmra.mrb[0].mxu1 %vm226_vm0, %v218_v10 }
  0x68   : > { %566 = vmatprep.mubr.msk.f32.mxu0 %vm226_vm0, %v215_v11  ;;  %572 = vmatprep.mubr.msk.f32.mxu1 %vm226_vm0, %v219_v12 }
  0x6b   : > { %567 = vmatmul.mubr.msk.f32.gmra.mrb[2].mxu0 %vm226_vm0, %v216_v13  ;;  %573 = vmatmul.mubr.msk.f32.gmra.mrb[2].mxu1 %vm226_vm0, %v220_v14 }
 0x13a   : > { %v565_v15 = vpop.f32.mrb[0].mxu0  ;;  %v571_v16 = vpop.f32.mrb[0].mxu1 }
 0x13b   : > { %vm361_vm2 = vcmp.ge.f32.partialorder %v565_v15, 0.0  ;;  %v369_v17 = vmul.f32 0.2, %v565_v15  ;;  %vm365_vm3 = vcmp.ge.f32.partialorder %v571_v16, 0.0  ;;  %v373_v18 = vmul.f32 0.2, %v571_v16 }
 0x13c   : > { %v321_v19 = vpop.f32.mrb[1].mxu0  ;;  %v341_v20 = vpop.f32.mrb[1].mxu1 }
 0x13d   : > { %v377_v21 = vsel %vm361_vm2, %v565_v15, %v369_v17  ;;  %v381_v22 = vsel %vm365_vm3, %v571_v16, %v373_v18  ;;  %vm360_vm4 = vcmp.ge.f32.partialorder %v321_v19, 0.0  ;;  %v368_v23 = vmul.f32 0.2, %v321_v19 }
 0x13e   : > { %385 = vst [vmem:[%s1026_s17 + $0x8] sm:$0xff] %v377_v21  ;;  %389 = vst [vmem:[%s1026_s17 + $0x28] sm:$0xff] %v381_v22  ;;  %vm364_vm5 = vcmp.ge.f32.partialorder %v341_v20, 0.0  ;;  %v372_v24 = vmul.f32 0.2, %v341_v20  ;;  %v568_v25 = vpop.f32.mrb[2].mxu0 }
 0x13f   : > { %v574_v26 = vpop.f32.mrb[2].mxu1  ;;  %v376_v27 = vsel %vm360_vm4, %v321_v19, %v368_v23  ;;  %vm363_vm6 = vcmp.ge.f32.partialorder %v568_v25, 0.0  ;;  %v371_v28 = vmul.f32 0.2, %v568_v25  ;;  %v331_v29 = vpop.f32.mrb[3].mxu0 }
 0x140   : > { %vm367_vm7 = vcmp.ge.f32.partialorder %v574_v26, 0.0  ;;  %v351_v30 = vpop.f32.mrb[3].mxu1  ;;  %384 = vst [vmem:[%s1026_s17] sm:$0xff] %v376_v27  ;;  %v380_v31 = vsel %vm364_vm5, %v341_v20, %v372_v24  ;;  %v375_v32 = vmul.f32 0.2, %v574_v26  ;;  %vm362_vm8 = vcmp.ge.f32.partialorder %v331_v29, 0.0 }
 0x141   : > { %v370_v33 = vmul.f32 0.2, %v331_v29  ;;  %388 = vst [vmem:[%s1026_s17 + $0x20] sm:$0xff] %v380_v31  ;;  %v379_v34 = vsel %vm363_vm6, %v568_v25, %v371_v28  ;;  %vm366_vm9 = vcmp.ge.f32.partialorder %v351_v30, 0.0  ;;  %v374_v35 = vmul.f32 0.2, %v351_v30 }
 0x142   : > { %387 = vst [vmem:[%s1026_s17 + $0x18] sm:$0xff] %v379_v34  ;;  %v383_v36 = vsel %vm367_vm7, %v574_v26, %v375_v32 }
 0x143   : > { %v378_v37 = vsel %vm362_vm8, %v331_v29, %v370_v33  ;;  %391 = vst [vmem:[%s1026_s17 + $0x38] sm:$0xff] %v383_v36  ;;  %v382_v38 = vsel %vm366_vm9, %v351_v30, %v374_v35 }
 0x144   : > { %386 = vst [vmem:[%s1026_s17 + $0x10] sm:$0xff] %v378_v37  ;;  %390 = vst [vmem:[%s1026_s17 + $0x30] sm:$0xff] %v382_v38 }
 0x145   : > { %737 = shalt.err (!%p734_p5)
}
 0x146   : > { %s738_s23 = scalar_lea.hbm %s1039_s7, 1024  ;;  %s742_s26 = scalar_lea.hbm %s1094_s2, 2048 }
 0x147   : > { %p739_p9 = scmp.ne.s32.totalorder %s1039_s7, %s738_s23  ;;  %p743_p3 = scmp.lt.u32.totalorder %s1039_s7, %s1094_s2 }
 0x148   : > { %p744_p7 = scmp.lt.u32.totalorder %s742_s26, %s738_s23  ;;  %p746_p4 = scmp.lt.u32.totalorder %s738_s23, %s1039_s7 }
 0x149   : > { %p740_p1 = pnand %p739_p9, %p933_p10 }
 0x14a   : > { %p745_p13 = por %p744_p7, %p743_p3 }
 0x14b   : > { %p741_p2 = pneg %p740_p1 }
 0x14c   : > { %p747_p6 = por %p746_p4, %p745_p13 }
 0x14e   : > { %p748_p8 = pnand %p747_p6, %p741_p2 }
 0x150   : > { %751 = shalt.err (!%p748_p8)
}
 0x151   : > { %s817_s8 = smov 128   ;;  %s818_s17 = smov 8  }
 0x152   : > { %595 = dma.vmem_to_hbm [thread:$0]  (%p933_p10), %s1032_s19, 1024, %s1039_s7, %s393_s4, %s817_s8, %s817_s8, %s818_s17  }
 0x153 PF: > { %s424_s21 = sand.u32 1, %s790_s9   ;;  %p1112_p12 = scmp.ne.s32.totalorder %s1102_s20, 0 }
 0x154   : > { %p1113_p11 = scmp.ge.s32.totalorder %s810_s14, 2  ;;  %s425_s12 = scalar_lea.sflag [#allocation4], %s424_s21 }
 0x156   : > { %p606_p0 = pnand %p1113_p11, %p1112_p12 }
 0x158   : > { %785 = dma.done.wait (!%p606_p0), %s425_s12, 1024  }
 0x159   : > { %787 = vsyncadd (!%p606_p0), %s425_s12, 4294966272  ;;  %s19_s14 = sadd.s32 1, %s810_s14   ;;  %s1114_s9 = smov %s794_s10 }
 0x15a   : > { %p16_p5 = scmp.ge.s32.totalorder %s19_s14, 4   ;;  %s1115_s10 = smov %s798_s11 }
 0x15b   : > { %s1116_s11 = smov %s942_s28  ;;  %s1117_s12 = smov %s806_s13 }
 0x15c   : > { %s1118_s13 = smov %s1120_s25  ;;  %18 = sbr.rel (!%p16_p5) target bundleno = 7 (0x7), region = 78 }
 0x163   :  { %430 = vsyncpa [#allocation3], 1 }
 0x164   :  { %432 = vsyncpa [#allocation3 + $0x1], 1 }
 0x165   :  { %433 = vsyncpa [#allocation6], 1 }
 0x166   :  { %434 = vsyncpa [#allocation4], 1 }
 0x167   :  { %436 = vsyncpa [#allocation4 + $0x1], 1 }

</bundles_post_ra>
